<compile_context>
chip_gen: v7x
topology: tpu7x:2x2x1
jax: 0.10.0
libtpu: 0.0.40
codegen_flags: <defaults>
</compile_context>

<pallas_src>
import jax
import jax.numpy as jnp
from jax.experimental import pallas as pl
from jax.experimental.pallas import tpu as pltpu


def mlp_kernel(x_ref,
               w1_ref, b1_ref,
               w2_ref, b2_ref,
               w3_ref, b3_ref,
               w4_ref, b4_ref,
               o_ref):
    # In-kernel bf16 cast of the streamed f32 activation tile (hidden under MXU).
    x = x_ref[...].astype(jnp.bfloat16)
    # fc1 + relu  (bf16 matmul inputs, f32 accumulate / bias / relu)
    h = jnp.dot(x, w1_ref[...], preferred_element_type=jnp.float32)
    h = jnp.maximum(h + b1_ref[...], 0.0)
    # fc2 + relu  (92 -> padded 128; extra columns stay exactly zero)
    h = jnp.dot(h.astype(jnp.bfloat16), w2_ref[...],
                preferred_element_type=jnp.float32)
    h = jnp.maximum(h + b2_ref[...], 0.0)
    # fc3 + relu  (64 -> padded 128; extra columns stay exactly zero)
    h = jnp.dot(h.astype(jnp.bfloat16), w3_ref[...],
                preferred_element_type=jnp.float32)
    h = jnp.maximum(h + b3_ref[...], 0.0)
    # fc4 (no activation)
    h = jnp.dot(h.astype(jnp.bfloat16), w4_ref[...],
                preferred_element_type=jnp.float32)
    o_ref[...] = (h + b4_ref[...]).astype(o_ref.dtype)


def _pad2d(a, rows, cols):
    r, c = a.shape
    return jnp.pad(a, ((0, rows - r), (0, cols - c)))


def prepare_kernel_params(params):
    """Zero-pad hidden dims to lane-aligned sizes and cast weights to bf16.

    Weight traffic is ~230 KiB total and DMA'd once per call, so doing the
    cast/pad in the wrapper is negligible (unlike the x stream).
    """
    w1 = params["w1"].astype(jnp.bfloat16)                       # (784, 128)
    b1 = params["b1"].astype(jnp.float32)                        # (1, 128)
    w2 = _pad2d(params["w2"], 128, 128).astype(jnp.bfloat16)     # (128, 92) -> (128, 128)
    b2 = _pad2d(params["b2"], 1, 128).astype(jnp.float32)        # (1, 92)   -> (1, 128)
    w3 = _pad2d(params["w3"], 128, 128).astype(jnp.bfloat16)     # (92, 64)  -> (128, 128)
    b3 = _pad2d(params["b3"], 1, 128).astype(jnp.float32)        # (1, 64)   -> (1, 128)
    w4 = _pad2d(params["w4"], 128, 10).astype(jnp.bfloat16)      # (64, 10)  -> (128, 10)
    b4 = params["b4"].astype(jnp.float32)                        # (1, 10)
    return w1, b1, w2, b2, w3, b3, w4, b4


def _choose_tb(B, tb_max=1024):
    """Batch-tile choice.

    * Large batches: tb_max (multiple of 8/128); >=2 grid steps fall out
      automatically, so v7x's two TensorCores both get work.
    * Small batches: split in two when 8-row alignment allows (v7x megacore),
      otherwise one full-extent tile (no (8,128) constraint when tb == B).
    """
    if B > tb_max:
        return tb_max
    if B >= 16 and B % 16 == 0:
        return max(B // 2, 8)
    return B


def simple_nn_forward(x_nchw, params, *, tb_max=1024):
    """x_nchw: (B, 1, 28, 28) float32. Returns (B, 10) float32 logits."""
    B = x_nchw.shape[0]
    x = x_nchw.reshape(B, -1)                 # torch.flatten(x, 1); stays float32
    K = x.shape[1]
    assert K == 28 * 28

    tb = _choose_tb(B, tb_max)
    n_tiles = pl.cdiv(B, tb)                  # partial last block handled by Pallas

    w1, b1, w2, b2, w3, b3, w4, b4 = prepare_kernel_params(params)

    const = lambda shape: pl.BlockSpec(shape, lambda i: (0, 0))   # VMEM-resident

    rows = n_tiles * tb
    flops = 2 * rows * (K * 128 + 128 * 128 + 128 * 128 + 128 * 10)
    bytes_accessed = (
        int(x.size) * 4                                        # f32 x stream
        + sum(int(w.size) * 2 for w in (w1, w2, w3, w4))       # bf16 weights
        + sum(int(b.size) * 4 for b in (b1, b2, b3, b4))       # f32 biases
        + B * 10 * 4                                           # f32 logits
    )

    out = pl.pallas_call(
        mlp_kernel,
        out_shape=jax.ShapeDtypeStruct((B, 10), jnp.float32),
        grid=(n_tiles,),
        in_specs=[
            pl.BlockSpec((tb, K), lambda i: (i, 0)),   # streamed f32 activation tiles
            const(w1.shape), const(b1.shape),
            const(w2.shape), const(b2.shape),
            const(w3.shape), const(b3.shape),
            const(w4.shape), const(b4.shape),
        ],
        out_specs=pl.BlockSpec((tb, 10), lambda i: (i, 0)),
        compiler_params=pltpu.CompilerParams(
            dimension_semantics=("parallel",)),
        cost_estimate=pl.CostEstimate(
            flops=flops, transcendentals=0, bytes_accessed=bytes_accessed),
    )(x, w1, b1, w2, b2, w3, b3, w4, b4)

    return out


def init_params(key):
    """Deterministic init mirroring nn.Linear shapes of simpleNN.

    Weights stored transposed as (in_features, out_features) so the kernel hot
    path is x @ W + b (== torch's x @ W.T + b with W=(out, in)).
    """
    dims = [(28 * 28, 128), (128, 92), (92, 64), (64, 10)]
    params = {}
    keys = jax.random.split(key, 2 * len(dims))
    for i, (fan_in, fan_out) in enumerate(dims):
        bound = 1.0 / jnp.sqrt(fan_in)  # PyTorch default Linear init range
        params[f"w{i + 1}"] = jax.random.uniform(
            keys[2 * i], (fan_in, fan_out),
            minval=-bound, maxval=bound, dtype=jnp.float32)
        params[f"b{i + 1}"] = jax.random.uniform(
            keys[2 * i + 1], (1, fan_out),
            minval=-bound, maxval=bound, dtype=jnp.float32)
    return params


def reference_forward_f32(x_nchw, params):
    """Original module semantics in f32."""
    x = x_nchw.reshape(x_nchw.shape[0], -1)
    h = jnp.maximum(x @ params["w1"] + params["b1"], 0.0)
    h = jnp.maximum(h @ params["w2"] + params["b2"], 0.0)
    h = jnp.maximum(h @ params["w3"] + params["b3"], 0.0)
    return h @ params["w4"] + params["b4"]


def reference_forward_bf16(x_nchw, params):
    """Reference matching the kernel's numerics (bf16 matmul inputs, f32 accum).

    NOTE: bf16 matmul inputs are an intentional precision trade; consumers
    needing strict f32 parity should compare against reference_forward_f32
    with loose tolerances.
    """
    x = x_nchw.reshape(x_nchw.shape[0], -1).astype(jnp.bfloat16)

    def lin(a, w, b):
        return jnp.dot(a, w.astype(jnp.bfloat16),
                       preferred_element_type=jnp.float32) + b

    h = jnp.maximum(lin(x, params["w1"], params["b1"]), 0.0)
    h = jnp.maximum(lin(h.astype(jnp.bfloat16), params["w2"], params["b2"]), 0.0)
    h = jnp.maximum(lin(h.astype(jnp.bfloat16), params["w3"], params["b3"]), 0.0)
    return lin(h.astype(jnp.bfloat16), params["w4"], params["b4"])


if __name__ == "__main__":
    key = jax.random.PRNGKey(0)
    k_params, k_x = jax.random.split(key)
    params = init_params(k_params)

    B = 8
    x = jax.random.normal(k_x, (B, 1, 28, 28), dtype=jnp.float32)

    out = simple_nn_forward(x, params)
    out = jax.block_until_ready(out)
    assert out.shape == (B, 10)

    # Tight check against a reference that uses the same bf16/f32 numerics.
    ref_bf16 = reference_forward_bf16(x, params)
    assert jnp.allclose(out, ref_bf16, atol=2e-3, rtol=2e-3), \
        "mismatch vs bf16-matched reference"

    # Loose check against the original all-f32 module semantics.
    ref_f32 = reference_forward_f32(x, params)
    assert jnp.allclose(out, ref_f32, atol=5e-2, rtol=5e-2), \
        "mismatch vs f32 reference"

    print("KERNEL_OK")
</pallas_src>

<mosaic_0001>
module attributes {stable_mosaic.version = 11 : i64} {
  func.func @mlp_kernel(%arg0: i32, %arg1: memref<8x784xf32, #tpu.memory_space<vmem>>, %arg2: memref<784x128xbf16, #tpu.memory_space<vmem>>, %arg3: memref<1x128xf32, #tpu.memory_space<vmem>>, %arg4: memref<128x128xbf16, #tpu.memory_space<vmem>>, %arg5: memref<1x128xf32, #tpu.memory_space<vmem>>, %arg6: memref<128x128xbf16, #tpu.memory_space<vmem>>, %arg7: memref<1x128xf32, #tpu.memory_space<vmem>>, %arg8: memref<128x10xbf16, #tpu.memory_space<vmem>>, %arg9: memref<1x10xf32, #tpu.memory_space<vmem>>, %arg10: memref<8x10xf32, #tpu.memory_space<vmem>>) attributes {dimension_semantics = [#tpu.dimension_semantics<parallel>], iteration_bounds = array<i64: 1>, scalar_prefetch = 0 : i64, scratch_operands = 0 : i64, tpu.core_type = #tpu.core_type<tc>, window_params = [{transform_indices = @transform_0, window_bounds = array<i64: 8, 784>}, {pipeline_mode = #tpu.pipeline_mode<synchronous>, transform_indices = @transform_1, window_bounds = array<i64: 784, 128>}, {pipeline_mode = #tpu.pipeline_mode<synchronous>, transform_indices = @transform_2, window_bounds = array<i64: 1, 128>}, {pipeline_mode = #tpu.pipeline_mode<synchronous>, transform_indices = @transform_3, window_bounds = array<i64: 128, 128>}, {pipeline_mode = #tpu.pipeline_mode<synchronous>, transform_indices = @transform_4, window_bounds = array<i64: 1, 128>}, {pipeline_mode = #tpu.pipeline_mode<synchronous>, transform_indices = @transform_5, window_bounds = array<i64: 128, 128>}, {pipeline_mode = #tpu.pipeline_mode<synchronous>, transform_indices = @transform_6, window_bounds = array<i64: 1, 128>}, {pipeline_mode = #tpu.pipeline_mode<synchronous>, transform_indices = @transform_7, window_bounds = array<i64: 128, 10>}, {pipeline_mode = #tpu.pipeline_mode<synchronous>, transform_indices = @transform_8, window_bounds = array<i64: 1, 10>}, {transform_indices = @transform_9, window_bounds = array<i64: 8, 10>}]} {
    %c0 = arith.constant 0 : index
    %c0_0 = arith.constant 0 : index
    %0 = vector.load %arg1[%c0, %c0_0] : memref<8x784xf32, #tpu.memory_space<vmem>>, vector<8x784xf32>
    %1 = arith.truncf %0 : vector<8x784xf32> to vector<8x784xbf16>
    %c0_1 = arith.constant 0 : index
    %c0_2 = arith.constant 0 : index
    %2 = vector.load %arg2[%c0_1, %c0_2] : memref<784x128xbf16, #tpu.memory_space<vmem>>, vector<784x128xbf16>
    %cst = arith.constant dense<0.000000e+00> : vector<8x128xf32>
    %3 = tpu.matmul %1, %2, %cst {dimension_numbers = #tpu.dot_dimension_numbers<[1], [0], [0], [1], [0, 0, 1, 1], [], []>} : vector<8x784xbf16>, vector<784x128xbf16>, vector<8x128xf32> -> vector<8x128xf32>
    %c0_3 = arith.constant 0 : index
    %c0_4 = arith.constant 0 : index
    %4 = vector.load %arg3[%c0_3, %c0_4] : memref<1x128xf32, #tpu.memory_space<vmem>>, vector<1x128xf32>
    %5 = vector.broadcast %4 : vector<1x128xf32> to vector<8x128xf32>
    %6 = arith.addf %3, %5 : vector<8x128xf32>
    %cst_5 = arith.constant 0.000000e+00 : f32
    %7 = vector.broadcast %cst_5 : f32 to vector<8x128xf32>
    %8 = arith.maximumf %6, %7 : vector<8x128xf32>
    %9 = arith.truncf %8 : vector<8x128xf32> to vector<8x128xbf16>
    %c0_6 = arith.constant 0 : index
    %c0_7 = arith.constant 0 : index
    %10 = vector.load %arg4[%c0_6, %c0_7] : memref<128x128xbf16, #tpu.memory_space<vmem>>, vector<128x128xbf16>
    %cst_8 = arith.constant dense<0.000000e+00> : vector<8x128xf32>
    %11 = tpu.matmul %9, %10, %cst_8 {dimension_numbers = #tpu.dot_dimension_numbers<[1], [0], [0], [1], [0, 0, 1, 1], [], []>} : vector<8x128xbf16>, vector<128x128xbf16>, vector<8x128xf32> -> vector<8x128xf32>
    %c0_9 = arith.constant 0 : index
    %c0_10 = arith.constant 0 : index
    %12 = vector.load %arg5[%c0_9, %c0_10] : memref<1x128xf32, #tpu.memory_space<vmem>>, vector<1x128xf32>
    %13 = vector.broadcast %12 : vector<1x128xf32> to vector<8x128xf32>
    %14 = arith.addf %11, %13 : vector<8x128xf32>
    %cst_11 = arith.constant 0.000000e+00 : f32
    %15 = vector.broadcast %cst_11 : f32 to vector<8x128xf32>
    %16 = arith.maximumf %14, %15 : vector<8x128xf32>
    %17 = arith.truncf %16 : vector<8x128xf32> to vector<8x128xbf16>
    %c0_12 = arith.constant 0 : index
    %c0_13 = arith.constant 0 : index
    %18 = vector.load %arg6[%c0_12, %c0_13] : memref<128x128xbf16, #tpu.memory_space<vmem>>, vector<128x128xbf16>
    %cst_14 = arith.constant dense<0.000000e+00> : vector<8x128xf32>
    %19 = tpu.matmul %17, %18, %cst_14 {dimension_numbers = #tpu.dot_dimension_numbers<[1], [0], [0], [1], [0, 0, 1, 1], [], []>} : vector<8x128xbf16>, vector<128x128xbf16>, vector<8x128xf32> -> vector<8x128xf32>
    %c0_15 = arith.constant 0 : index
    %c0_16 = arith.constant 0 : index
    %20 = vector.load %arg7[%c0_15, %c0_16] : memref<1x128xf32, #tpu.memory_space<vmem>>, vector<1x128xf32>
    %21 = vector.broadcast %20 : vector<1x128xf32> to vector<8x128xf32>
    %22 = arith.addf %19, %21 : vector<8x128xf32>
    %cst_17 = arith.constant 0.000000e+00 : f32
    %23 = vector.broadcast %cst_17 : f32 to vector<8x128xf32>
    %24 = arith.maximumf %22, %23 : vector<8x128xf32>
    %25 = arith.truncf %24 : vector<8x128xf32> to vector<8x128xbf16>
    %c0_18 = arith.constant 0 : index
    %c0_19 = arith.constant 0 : index
    %26 = vector.load %arg8[%c0_18, %c0_19] : memref<128x10xbf16, #tpu.memory_space<vmem>>, vector<128x10xbf16>
    %cst_20 = arith.constant dense<0.000000e+00> : vector<8x10xf32>
    %27 = tpu.matmul %25, %26, %cst_20 {dimension_numbers = #tpu.dot_dimension_numbers<[1], [0], [0], [1], [0, 0, 1, 1], [], []>} : vector<8x128xbf16>, vector<128x10xbf16>, vector<8x10xf32> -> vector<8x10xf32>
    %c0_21 = arith.constant 0 : index
    %c0_22 = arith.constant 0 : index
    %28 = vector.load %arg9[%c0_21, %c0_22] : memref<1x10xf32, #tpu.memory_space<vmem>>, vector<1x10xf32>
    %29 = vector.broadcast %28 : vector<1x10xf32> to vector<8x10xf32>
    %30 = arith.addf %27, %29 : vector<8x10xf32>
    %c0_23 = arith.constant 0 : index
    %c0_24 = arith.constant 0 : index
    %31 = vector.load %arg10[%c0_23, %c0_24] : memref<8x10xf32, #tpu.memory_space<vmem>>, vector<8x10xf32>
    tpu.vector_store %arg10[%c0_23, %c0_24], %30 {strides = array<i32>} : memref<8x10xf32, #tpu.memory_space<vmem>>, vector<8x10xf32>,
    return
  }
  func.func @transform_0(%arg0: i32) -> (i32, i32) {
    %c0_i32 = arith.constant 0 : i32
    %c0_i32_0 = arith.constant 0 : i32
    return %arg0, %c0_i32 : i32, i32
  }
  func.func @transform_1(%arg0: i32) -> (i32, i32) {
    %c0_i32 = arith.constant 0 : i32
    %c0_i32_0 = arith.constant 0 : i32
    %c0_i32_1 = arith.constant 0 : i32
    return %c0_i32, %c0_i32_0 : i32, i32
  }
  func.func @transform_2(%arg0: i32) -> (i32, i32) {
    %c0_i32 = arith.constant 0 : i32
    %c0_i32_0 = arith.constant 0 : i32
    %c0_i32_1 = arith.constant 0 : i32
    return %c0_i32, %c0_i32_0 : i32, i32
  }
  func.func @transform_3(%arg0: i32) -> (i32, i32) {
    %c0_i32 = arith.constant 0 : i32
    %c0_i32_0 = arith.constant 0 : i32
    %c0_i32_1 = arith.constant 0 : i32
    return %c0_i32, %c0_i32_0 : i32, i32
  }
  func.func @transform_4(%arg0: i32) -> (i32, i32) {
    %c0_i32 = arith.constant 0 : i32
    %c0_i32_0 = arith.constant 0 : i32
    %c0_i32_1 = arith.constant 0 : i32
    return %c0_i32, %c0_i32_0 : i32, i32
  }
  func.func @transform_5(%arg0: i32) -> (i32, i32) {
    %c0_i32 = arith.constant 0 : i32
    %c0_i32_0 = arith.constant 0 : i32
    %c0_i32_1 = arith.constant 0 : i32
    return %c0_i32, %c0_i32_0 : i32, i32
  }
  func.func @transform_6(%arg0: i32) -> (i32, i32) {
    %c0_i32 = arith.constant 0 : i32
    %c0_i32_0 = arith.constant 0 : i32
    %c0_i32_1 = arith.constant 0 : i32
    return %c0_i32, %c0_i32_0 : i32, i32
  }
  func.func @transform_7(%arg0: i32) -> (i32, i32) {
    %c0_i32 = arith.constant 0 : i32
    %c0_i32_0 = arith.constant 0 : i32
    %c0_i32_1 = arith.constant 0 : i32
    return %c0_i32, %c0_i32_0 : i32, i32
  }
  func.func @transform_8(%arg0: i32) -> (i32, i32) {
    %c0_i32 = arith.constant 0 : i32
    %c0_i32_0 = arith.constant 0 : i32
    %c0_i32_1 = arith.constant 0 : i32
    return %c0_i32, %c0_i32_0 : i32, i32
  }
  func.func @transform_9(%arg0: i32) -> (i32, i32) {
    %c0_i32 = arith.constant 0 : i32
    %c0_i32_0 = arith.constant 0 : i32
    return %arg0, %c0_i32 : i32, i32
  }
}

</mosaic_0001>

<bundles_post_ra>
// kernel: tpu_custom_call.1
= control target key start
LH: loop header
LB: loop body
LE: loop exit
PB: predicated region body
PF: predicated region fallthrough
CT: control target
= control target key end

     0   :  { %14 = vsyncpa [#allocation3], 0  ;;  %s1626_s0 = inlined_call_operand.hbm [shape: f32[8,784], index: 0, kind: input, shape index: {}]   ;;  %s1627_s1 = inlined_call_operand.hbm [shape: bf16[784,128], index: 1, kind: input, shape index: {}]   ;;  %s1628_s2 = inlined_call_operand.vmem [shape: f32[1,128], index: 2, kind: input, shape index: {}]   ;;  %s1629_s3 = inlined_call_operand.vmem [shape: bf16[128,128], index: 3, kind: input, shape index: {}]   ;;  %s1630_s4 = inlined_call_operand.vmem [shape: f32[1,128], index: 4, kind: input, shape index: {}]   ;;  %s1631_s5 = inlined_call_operand.hbm [shape: bf16[128,128], index: 5, kind: input, shape index: {}]   ;;  %s1632_s6 = inlined_call_operand.vmem [shape: f32[1,128], index: 6, kind: input, shape index: {}]   ;;  %s1633_s7 = inlined_call_operand.vmem [shape: bf16[128,10], index: 7, kind: input, shape index: {}]   ;;  %s1634_s8 = inlined_call_operand.vmem [shape: f32[1,10], index: 8, kind: input, shape index: {}]   ;;  %s1635_s9 = inlined_call_operand.hbm [shape: f32[8,10], index: 9, kind: output, shape index: {}]  }
   0x1   :  { %15 = vsyncpa [#allocation6], 0 }
   0x2   :  { %16 = vsyncpa [#allocation4], 0  ;;  %s1421_s30 = smov [#allocation5]   ;;  %s1327_s13 = scalar_lea.hbm %s1627_s1, 6272 }
   0x3   :  { %s32_s10 = sshll.u32 %s1421_s30, 4  ;;  %p1328_p0 = scmp.ne.s32.totalorder %s1627_s1, %s1327_s13  ;;  %s33_s10 = int_to_ptr.vmem [resolvable:$true] %s32_s10 }
   0x4   :  { %p1331_p1 = scmp.lt.u32.totalorder %s1327_s13, %s1627_s1 }
   0x6   :  { %p1333_p2 = pnand %p1331_p1, %p1328_p0 }
   0x8   :  { %1336 = shalt.err (!%p1333_p2)
}
   0x9   :  { %s1337_s18 = scalar_lea.vmem %s33_s10, 6272  ;;  %p1342_p4 = scmp.lt.s32.totalorder %s33_s10, %s33_s10 }
   0xa   :  { %p1338_p3 = scmp.ne.s32.totalorder %s33_s10, %s1337_s18  ;;  %p1343_p5 = scmp.lt.s32.totalorder %s1337_s18, %s1337_s18 }
   0xc   :  { %p1344_p6 = por %p1343_p5, %p1342_p4 }
   0xe   :  { %p1345_p7 = pnand %p1344_p6, %p1338_p3 }
  0x10   :  { %1348 = shalt.err (!%p1345_p7)
}
  0x11   :  { %s1422_s19 = smov 64   ;;  %s1423_s20 = smov 4  }
  0x12   :  { %38 = dma.hbm_to_vmem [thread:$0]  %s1627_s1, 6272, %s33_s10, [#allocation6], %s1422_s19, %s1422_s19, %s1423_s20  }
  0x13   :  { %s1424_s23 = smov [#allocation2]   ;;  %s1425_s25 = smov [#allocation7]  }
  0x14   :  { %s23_s24 = sshll.u32 %s1424_s23, 4  ;;  %s50_s26 = sshll.u32 %s1425_s25, 4  ;;  %s24_s24 = int_to_ptr.vmem [resolvable:$true] %s23_s24  ;;  %s51_s26 = int_to_ptr.vmem [resolvable:$true] %s50_s26 }
  0x15   :  { %s1349_s29 = scalar_lea.hbm %s1626_s0, 896 }
  0x16   :  { %p1350_p8 = scmp.ne.s32.totalorder %s1626_s0, %s1349_s29  ;;  %p1353_p9 = scmp.lt.u32.totalorder %s1349_s29, %s1626_s0 }
  0x18   :  { %p1355_p10 = pnand %p1353_p9, %p1350_p8 }
  0x1a   :  { %1358 = shalt.err (!%p1355_p10)
}
  0x1b   :  { %s1359_s1 = scalar_lea.vmem %s24_s24, 896  ;;  %p1364_p12 = scmp.lt.s32.totalorder %s24_s24, %s24_s24 }
  0x1c   :  { %p1360_p11 = scmp.ne.s32.totalorder %s24_s24, %s1359_s1  ;;  %p1365_p13 = scmp.lt.s32.totalorder %s1359_s1, %s1359_s1 }
  0x1e   :  { %p1366_p0 = por %p1365_p13, %p1364_p12 }
  0x20   :  { %p1367_p1 = pnand %p1366_p0, %p1360_p11 }
  0x22   :  { %1370 = shalt.err (!%p1367_p1)
}
  0x23   :  { %26 = dma.hbm_to_vmem [thread:$0]  %s1626_s0, 896, %s24_s24, [#allocation3]  }
  0x24   :  { %s1371_s17 = scalar_lea.hbm %s1631_s5, 1024 }
  0x25   :  { %p1372_p2 = scmp.ne.s32.totalorder %s1631_s5, %s1371_s17  ;;  %p1375_p3 = scmp.lt.u32.totalorder %s1371_s17, %s1631_s5 }
  0x27   :  { %p1377_p4 = pnand %p1375_p3, %p1372_p2 }
  0x29   :  { %1380 = shalt.err (!%p1377_p4)
}
  0x2a   :  { %s1381_s25 = scalar_lea.vmem %s51_s26, 1024  ;;  %p1386_p6 = scmp.lt.s32.totalorder %s51_s26, %s51_s26 }
  0x2b   :  { %p1382_p5 = scmp.ne.s32.totalorder %s51_s26, %s1381_s25  ;;  %p1387_p7 = scmp.lt.s32.totalorder %s1381_s25, %s1381_s25 }
  0x2d   :  { %p1388_p8 = por %p1387_p7, %p1386_p6 }
  0x2f   :  { %p1389_p9 = pnand %p1388_p8, %p1382_p5 }
  0x31   :  { %1392 = shalt.err (!%p1389_p9)
}
  0x32   :  { %56 = dma.hbm_to_vmem [thread:$0]  %s1631_s5, 1024, %s51_s26, [#allocation6], %s1422_s19, %s1422_s19, %s1423_s20  }
  0x33   :  { %1415 = dma.done.wait [#allocation3], 896  }
  0x34   :  { %1416 = vsyncadd [#allocation3], 4294966400 }
  0x35   :  { %1417 = dma.done.wait [#allocation6], 7296  }
  0x36   :  { %1418 = vsyncadd [#allocation6], 4294960000  ;;  %v1254_v0 = vld [vmem:[#allocation5 + $0x40] sm:$0xff]   ;;  %v1258_v4 = vld [vmem:[#allocation5 + $0x48] sm:$0xff]   ;;  %v1426_v44 = vmov 0.0   ;;  %vm1427_vm0 = vmmov 0  }
  0x37   :  { %v1255_v1 = vld [vmem:[#allocation5] sm:$0xff]   ;;  %1085 = vmatprep.subr.bf16.mxu0 %v1254_v0  ;;  %v1259_v5 = vld [vmem:[#allocation5 + $0x8] sm:$0xff]   ;;  %v1262_v8 = vld [vmem:[#allocation5 + $0x50] sm:$0xff]   ;;  %vm486_vm1 = vcmask 130048   ;;  %s1428_s14 = smov [#allocation8]   ;;  %vm989_vm2 = vcmask 80896  }
  0x38   :  { %v1256_v2 = vld [vmem:[#allocation5 + $0xc0] sm:$0xff]   ;;  %1086 = vmatpush3.bf16.msra.mxu0 %v1255_v1  ;;  %v1260_v6 = vld [vmem:[#allocation5 + $0xc8] sm:$0xff]   ;;  %v1263_v9 = vld [vmem:[#allocation5 + $0x10] sm:$0xff]   ;;  %s997_s15 = sshll.u32 %s1428_s14, 4  ;;  %s998_s15 = int_to_ptr.vmem [resolvable:$true] %s997_s15 }
  0x39   :  { %v1257_v3 = vld [vmem:[#allocation5 + $0x80] sm:$0xff]   ;;  %1107 = vmatprep.subr.bf16.mxu1 %v1256_v2  ;;  %1087 = vmatprep.subr.bf16.mxu0 %v1258_v4  ;;  %v1261_v7 = vld [vmem:[#allocation5 + $0x88] sm:$0xff]   ;;  %v1264_v10 = vld [vmem:[#allocation5 + $0xd0] sm:$0xff]   ;;  %p1398_p11 = scmp.lt.s32.totalorder %s998_s15, %s998_s15 }
  0x3a   :  { %1108 = vmatpush3.bf16.msra.mxu1 %v1257_v3  ;;  %v1265_v11 = vld [vmem:[#allocation5 + $0x90] sm:$0xff]   ;;  %v1266_v12 = vld [vmem:[#allocation5 + $0x58] sm:$0xff]   ;;  %v1270_v16 = vld [vmem:[#allocation5 + $0x60] sm:$0xff]  }
  0x3b   :  { %1109 = vmatprep.subr.bf16.mxu1 %v1260_v6  ;;  %v1267_v13 = vld [vmem:[#allocation5 + $0x18] sm:$0xff]   ;;  %v1271_v17 = vld [vmem:[#allocation5 + $0x20] sm:$0xff]   ;;  %v1274_v20 = vld [vmem:[#allocation5 + $0x68] sm:$0xff]  }
  0x3c   :  { %1088 = vmatpush3.bf16.msra.mxu0 %v1259_v5  ;;  %v1268_v14 = vld [vmem:[#allocation5 + $0xd8] sm:$0xff]   ;;  %v1272_v18 = vld [vmem:[#allocation5 + $0xe0] sm:$0xff]   ;;  %v1275_v21 = vld [vmem:[#allocation5 + $0x28] sm:$0xff]  }
  0x3d   :  { %1089 = vmatprep.subr.bf16.mxu0 %v1262_v8  ;;  %v1269_v15 = vld [vmem:[#allocation5 + $0x98] sm:$0xff]   ;;  %v1273_v19 = vld [vmem:[#allocation5 + $0xa0] sm:$0xff]   ;;  %v1276_v22 = vld [vmem:[#allocation5 + $0xe8] sm:$0xff]  }
  0x3e   :  { %1110 = vmatpush3.bf16.msra.mxu1 %v1261_v7  ;;  %v1277_v23 = vld [vmem:[#allocation5 + $0xa8] sm:$0xff]   ;;  %v1278_v24 = vld [vmem:[#allocation5 + $0x70] sm:$0xff]   ;;  %v1282_v28 = vld [vmem:[#allocation5 + $0x78] sm:$0xff]  }
  0x3f   :  { %1111 = vmatprep.subr.bf16.mxu1 %v1264_v10  ;;  %v1279_v25 = vld [vmem:[#allocation5 + $0x30] sm:$0xff]   ;;  %v1283_v29 = vld [vmem:[#allocation5 + $0x38] sm:$0xff]   ;;  %v73_v34 = vld [vmem:[#allocation2] sm:$0xff] }
  0x40   :  { %1090 = vmatpush3.bf16.msra.mxu0 %v1263_v9  ;;  %v1280_v26 = vld [vmem:[#allocation5 + $0xf0] sm:$0xff]   ;;  %v1284_v30 = vld [vmem:[#allocation5 + $0xf8] sm:$0xff]   ;;  %v80_v35 = vpack.c.bf16 %v73_v34, %v73_v34  ;;  %v1286_v36 = vld [vmem:[#allocation5 + $0x140] sm:$0xff]  }
  0x41   :  { %1091 = vmatprep.subr.bf16.mxu0 %v1266_v12  ;;  %v1281_v27 = vld [vmem:[#allocation5 + $0xb0] sm:$0xff]   ;;  %v1285_v33 = vld [vmem:[#allocation5 + $0xb8] sm:$0xff]   ;;  %v76_v37 = vld [vmem:[#allocation2 + $0x18] sm:$0xff] }
  0x42   :  { %1112 = vmatpush3.bf16.msra.mxu1 %v1265_v11  ;;  %v74_v31 = vld [vmem:[#allocation2 + $0x8] sm:$0xff]  ;;  %v83_v38 = vpack.c.bf16 %v76_v37, %v76_v37  ;;  %v1287_v39 = vld [vmem:[#allocation5 + $0x100] sm:$0xff]   ;;  %v75_v40 = vld [vmem:[#allocation2 + $0x10] sm:$0xff] }
  0x43   :  { %1113 = vmatprep.subr.bf16.mxu1 %v1268_v14  ;;  %v81_v32 = vpack.c.bf16 %v74_v31, %v74_v31  ;;  %v82_v41 = vpack.c.bf16 %v75_v40, %v75_v40  ;;  %v1288_v42 = vld [vmem:[#allocation5 + $0x148] sm:$0xff]   ;;  %v1290_v45 = vld [vmem:[#allocation5 + $0x150] sm:$0xff]   ;;  %v1292_v47 = vld [vmem:[#allocation5 + $0x158] sm:$0xff]  }
  0x44   :  { %1092 = vmatpush3.bf16.msra.mxu0 %v1267_v13  ;;  %562 = vmatprep.mubr.bf16.mxu1 %v83_v38  ;;  %v1289_v43 = vld [vmem:[#allocation5 + $0x108] sm:$0xff]   ;;  %v1291_v46 = vld [vmem:[#allocation5 + $0x110] sm:$0xff]   ;;  %v1293_v48 = vld [vmem:[#allocation5 + $0x118] sm:$0xff]  }
  0x45   :  { %1093 = vmatprep.subr.bf16.mxu0 %v1270_v16  ;;  %522 = vmatprep.mubr.bf16.mxu0 %v81_v32  ;;  %v1294_v49 = vld [vmem:[#allocation5 + $0x160] sm:$0xff]   ;;  %v1296_v51 = vld [vmem:[#allocation5 + $0x168] sm:$0xff]   ;;  %v78_v54 = vld [vmem:[#allocation2 + $0x28] sm:$0xff] }
  0x46   :  { %1114 = vmatpush3.bf16.msra.mxu1 %v1269_v15  ;;  %v1295_v50 = vld [vmem:[#allocation5 + $0x120] sm:$0xff]   ;;  %v1297_v52 = vld [vmem:[#allocation5 + $0x128] sm:$0xff]   ;;  %v1298_v55 = vld [vmem:[#allocation5 + $0x170] sm:$0xff]   ;;  %v85_v56 = vpack.c.bf16 %v78_v54, %v78_v54 }
  0x47   :  { %1115 = vmatprep.subr.bf16.mxu1 %v1272_v18  ;;  %v1302_v53 = vld [vmem:[#allocation5 + $0x180] sm:$0xff]   ;;  %v79_v57 = vld [vmem:[#allocation2 + $0x30] sm:$0xff]  ;;  %v1299_v59 = vld [vmem:[#allocation5 + $0x130] sm:$0xff]  }
  0x48   :  { %1094 = vmatpush3.bf16.msra.mxu0 %v1271_v17  ;;  %v86_v58 = vpack.c.bf16 %v79_v57, %v79_v57  ;;  %v1300_v60 = vld [vmem:[#allocation5 + $0x178] sm:$0xff]   ;;  %v77_v62 = vld [vmem:[#allocation2 + $0x20] sm:$0xff]  ;;  %v1304_v1 = vld [vmem:[%s1629_s3 + $0x8] sm:$0xff]  }
  0x49   :  { %1095 = vmatprep.subr.bf16.mxu0 %v1274_v20  ;;  %v1301_v61 = vld [vmem:[#allocation5 + $0x138] sm:$0xff]   ;;  %v84_v63 = vpack.c.bf16 %v77_v62, %v77_v62  ;;  %v1303_v0 = vld [vmem:[%s1629_s3] sm:$0xff]   ;;  %v1306_v3 = vld [vmem:[%s1629_s3 + $0x18] sm:$0xff]  }
  0x4a   :  { %1116 = vmatpush3.bf16.msra.mxu1 %v1273_v19  ;;  %v1305_v2 = vld [vmem:[%s1629_s3 + $0x10] sm:$0xff]   ;;  %v1307_v4 = vld [vmem:[%s1629_s3 + $0x20] sm:$0xff]   ;;  %v1308_v5 = vld [vmem:[%s1629_s3 + $0x28] sm:$0xff]  }
  0x4b   :  { %1117 = vmatprep.subr.bf16.mxu1 %v1276_v22  ;;  %v1309_v6 = vld [vmem:[%s1629_s3 + $0x30] sm:$0xff]   ;;  %v1310_v7 = vld [vmem:[%s1629_s3 + $0x38] sm:$0xff]   ;;  %v1311_v8 = vld [vmem:[#allocation7] sm:$0xff]  }
  0x4c   :  { %1096 = vmatpush3.bf16.msra.mxu0 %v1275_v21  ;;  %v1312_v9 = vld [vmem:[#allocation7 + $0x8] sm:$0xff]   ;;  %v1313_v10 = vld [vmem:[#allocation7 + $0x10] sm:$0xff]   ;;  %v1314_v11 = vld [vmem:[#allocation7 + $0x18] sm:$0xff]  }
  0x4d   :  { %1097 = vmatprep.subr.bf16.mxu0 %v1278_v24  ;;  %v1315_v12 = vld [vmem:[#allocation7 + $0x20] sm:$0xff]   ;;  %v1316_v13 = vld [vmem:[#allocation7 + $0x28] sm:$0xff]   ;;  %v1317_v40 = vld [vmem:[#allocation7 + $0x30] sm:$0xff]  }
  0x4e   :  { %1118 = vmatpush3.bf16.msra.mxu1 %v1277_v23  ;;  %v1007_v15 = vld [vmem:[%s1628_s2] ss:$0 sm:$0xff]  ;;  %v1325_v57 = vld [vmem:[%s1633_s7 + $0x30] sm:$0xff]  }
  0x4f   :  { %1119 = vmatprep.subr.bf16.mxu1 %v1280_v26 }
  0x50   :  { %1098 = vmatpush3.bf16.msra.mxu0 %v1279_v25 }
  0x51   :  { %1099 = vmatprep.subr.bf16.mxu0 %v1282_v28 }
  0x52   :  { %1120 = vmatpush3.bf16.msra.mxu1 %v1281_v27 }
  0x53   :  { %1121 = vmatprep.subr.bf16.mxu1 %v1284_v30 }
  0x54   :  { %1100 = vmatpush3.bf16.msra.mxu0 %v1283_v29 }
  0x55   :  { %1129 = vmatprep.subr.bf16.mxu0 %v1286_v36 }
  0x56   :  { %1122 = vmatpush3.bf16.msra.mxu1 %v1285_v33 }
  0x57   :  { %523 = vmatmul.mubr.bf16.vlgmr.msra.gmra.mrb[0].mxu0 %v80_v35  ;;  %1180 = vmatprep.subr.bf16.mxu1 %v1426_v44 }
  0x58   :  { %1130 = vmatpush3.bf16.msra.mxu0 %v1287_v39  ;;  %602 = vmatprep.mubr.bf16.mxu0 %v85_v56 }
  0x59   :  { %563 = vmatmul.mubr.bf16.vlgmr.msra.gmra.mrb[0].mxu1 %v82_v41  ;;  %1131 = vmatprep.subr.bf16.mxu0 %v1288_v42  ;;  %v1318_v41 = vld [vmem:[#allocation7 + $0x38] sm:$0xff]   ;;  %v1319_v42 = vld [vmem:[%s1633_s7] sm:$0xff]  }
  0x5a   :  { %1182 = vmatprep.mubr.msk.bf16.mxu1 %vm1427_vm0, %v1426_v44  ;;  %1181 = vmatpush3.bf16.msra.mxu1 %v1302_v53 }
  0x5b   :  { %1186 = vmatprep.subr.bf16.mxu1 %v1426_v44 }
  0x5c   :  { %1132 = vmatpush3.bf16.msra.mxu0 %v1289_v43  ;;  %v1320_v43 = vld [vmem:[%s1633_s7 + $0x8] sm:$0xff]  }
  0x5d   :  { %1133 = vmatprep.subr.bf16.mxu0 %v1290_v45  ;;  %v1321_v45 = vld [vmem:[%s1633_s7 + $0x10] sm:$0xff]  }
  0x60   :  { %1134 = vmatpush3.bf16.msra.mxu0 %v1291_v46  ;;  %v1322_v46 = vld [vmem:[%s1633_s7 + $0x18] sm:$0xff]  }
  0x61   :  { %1135 = vmatprep.subr.bf16.mxu0 %v1292_v47  ;;  %1183 = vmatmul.mubr.msk.bf16.vlgmr.msra.gmra.mrb[4].mxu1 %vm486_vm1, %v86_v58  ;;  %v1323_v47 = vld [vmem:[%s1633_s7 + $0x20] sm:$0xff]   ;;  %v1326_v58 = vld [vmem:[%s1633_s7 + $0x38] sm:$0xff]  }
  0x62   :  { %1202 = vmatprep.mubr.msk.bf16.mxu1 %vm1427_vm0, %v1426_v44  ;;  %1187 = vmatpush3.bf16.msra.mxu1 %v1303_v0 }
  0x63   :  { %1188 = vmatprep.subr.bf16.mxu1 %v1426_v44 }
  0x64   :  { %1136 = vmatpush3.bf16.msra.mxu0 %v1293_v48  ;;  %v1324_v48 = vld [vmem:[%s1633_s7 + $0x28] sm:$0xff]  }
  0x65   :  { %1137 = vmatprep.subr.bf16.mxu0 %v1294_v49  ;;  %v1058_v49 = vld [vmem:[%s1630_s4] ss:$0 sm:$0xff] }
  0x66   :  { %1189 = vmatpush3.bf16.msra.mxu1 %v1304_v1 }
  0x67   :  { %1190 = vmatprep.subr.bf16.mxu1 %v1426_v44 }
  0x68   :  { %1138 = vmatpush3.bf16.msra.mxu0 %v1295_v50 }
  0x69   :  { %1139 = vmatprep.subr.bf16.mxu0 %v1296_v51 }
  0x6a   :  { %1191 = vmatpush3.bf16.msra.mxu1 %v1305_v2 }
  0x6b   :  { %1192 = vmatprep.subr.bf16.mxu1 %v1426_v44 }
  0x6c   :  { %1140 = vmatpush3.bf16.msra.mxu0 %v1297_v52 }
  0x6d   :  { %1141 = vmatprep.subr.bf16.mxu0 %v1298_v55 }
  0x6e   :  { %1193 = vmatpush3.bf16.msra.mxu1 %v1306_v3 }
  0x6f   :  { %1194 = vmatprep.subr.bf16.mxu1 %v1426_v44 }
  0x70   :  { %1142 = vmatpush3.bf16.msra.mxu0 %v1299_v59  ;;  %v1067_v59 = vld [vmem:[%s1632_s6] ss:$0 sm:$0xff]  ;;  %s1393_s6 = scalar_lea.vmem %s998_s15, 128 }
  0x71   :  { %1143 = vmatprep.subr.bf16.mxu0 %v1300_v60  ;;  %p1394_p10 = scmp.ne.s32.totalorder %s998_s15, %s1393_s6  ;;  %p1399_p12 = scmp.lt.s32.totalorder %s1393_s6, %s1393_s6 }
  0x72   :  { %1195 = vmatpush3.bf16.msra.mxu1 %v1307_v4 }
  0x73   :  { %1196 = vmatprep.subr.bf16.mxu1 %v1426_v44  ;;  %p1400_p13 = por %p1399_p12, %p1398_p11 }
  0x74   :  { %1144 = vmatpush3.bf16.msra.mxu0 %v1301_v61 }
  0x75   :  { %1206 = vmatprep.subr.bf16.mxu0 %v1426_v44  ;;  %p1401_p0 = pnand %p1400_p13, %p1394_p10 }
  0x76   :  { %1197 = vmatpush3.bf16.msra.mxu1 %v1308_v5 }
  0x77   :  { %603 = vmatmul.mubr.bf16.vlgmr.msra.gmra.mrb[4].mxu0 %v84_v63  ;;  %1198 = vmatprep.subr.bf16.mxu1 %v1426_v44 }
  0x78   :  { %1222 = vmatprep.mubr.msk.bf16.mxu0 %vm1427_vm0, %v1426_v44  ;;  %1207 = vmatpush3.bf16.msra.mxu0 %v1311_v8 }
  0x79   :  { %1208 = vmatprep.subr.bf16.mxu0 %v1426_v44 }
  0x7a   :  { %1199 = vmatpush3.bf16.msra.mxu1 %v1309_v6 }
  0x7b   :  { %1200 = vmatprep.subr.bf16.mxu1 %v1426_v44 }
  0x7c   :  { %1209 = vmatpush3.bf16.msra.mxu0 %v1312_v9 }
  0x7d   :  { %1210 = vmatprep.subr.bf16.mxu0 %v1426_v44 }
  0x7e   :  { %1201 = vmatpush3.bf16.msra.mxu1 %v1310_v7 }
  0x7f   :  { %1226 = vmatprep.subr.bf16.mxu1 %v1426_v44 }
  0x80   :  { %1211 = vmatpush3.bf16.msra.mxu0 %v1313_v10 }
  0x81   :  { %1212 = vmatprep.subr.bf16.mxu0 %v1426_v44 }
  0x84   :  { %1213 = vmatpush3.bf16.msra.mxu0 %v1314_v11 }
  0x85   :  { %1214 = vmatprep.subr.bf16.mxu0 %v1426_v44 }
  0x88   :  { %1215 = vmatpush3.bf16.msra.mxu0 %v1315_v12 }
  0x89   :  { %1216 = vmatprep.subr.bf16.mxu0 %v1426_v44 }
  0x8c   :  { %1217 = vmatpush3.bf16.msra.mxu0 %v1316_v13 }
  0x8d   :  { %1218 = vmatprep.subr.bf16.mxu0 %v1426_v44 }
  0x90   :  { %1219 = vmatpush3.bf16.msra.mxu0 %v1317_v40 }
  0x91   :  { %1220 = vmatprep.subr.bf16.mxu0 %v1426_v44 }
  0x94   :  { %1221 = vmatpush3.bf16.msra.mxu0 %v1318_v41 }
 0x12a   :  { %v1101_v14 = vpop.f32.mrb[0].mxu0 }
 0x12b   :  { %v1102_v16 = vpop.f32.mrb[1].mxu0 }
 0x12c   :  { %v1103_v17 = vadd.f32 %v1102_v16, %v1101_v14  ;;  %v1104_v18 = vpop.f32.mrb[2].mxu0  ;;  %v1123_v19 = vpop.f32.mrb[0].mxu1 }
 0x12d   :  { %v1105_v20 = vpop.f32.mrb[3].mxu0  ;;  %v1124_v22 = vpop.f32.mrb[1].mxu1 }
 0x12e   :  { %v525_v21 = vadd.f32 %v1103_v17, %v1007_v15  ;;  %v1125_v23 = vadd.f32 %v1124_v22, %v1123_v19  ;;  %v1126_v24 = vpop.f32.mrb[2].mxu1 }
 0x12f   :  { %v1127_v25 = vpop.f32.mrb[3].mxu1 }
 0x130   :  { %v565_v26 = vadd.f32 %v1125_v23, %v525_v21 }
 0x134   :  { %v644_v27 = vpop.f32.mrb[4].mxu1 }
 0x135   :  { %v1184_v28 = vpop.f32.mrb[5].mxu1 }
 0x136   :  { %v647_v29 = vpop.f32.mrb[6].mxu1 }
 0x137   :  { %v1185_v30 = vpop.f32.mrb[7].mxu1 }
 0x14a   :  { %v1145_v31 = vpop.f32.mrb[4].mxu0 }
 0x14b   :  { %v1146_v32 = vpop.f32.mrb[5].mxu0 }
 0x14c   :  { %v1147_v33 = vadd.f32 %v1146_v32, %v1145_v31  ;;  %v1148_v34 = vpop.f32.mrb[6].mxu0 }
 0x14d   :  { %v1149_v35 = vpop.f32.mrb[7].mxu0 }
 0x14e   :  { %v605_v36 = vadd.f32 %v1147_v33, %v565_v26 }
 0x150   :  { %v645_v37 = vadd.f32 %v644_v27, %v605_v36 }
 0x152   :  { %v650_v38 = vmax.f32 %v645_v37, 0.0 }
 0x154   :  { %v651_v39 = vpack.c.bf16 %v650_v38, %v650_v38 }
 0x156   :  { %1203 = vmatmul.mubr.bf16.vlgmr.msra.gmra.mrb[8].mxu1 %v651_v39 }
 0x157   :  { %1242 = vmatprep.mubr.msk.bf16.mxu1 %vm1427_vm0, %v1426_v44  ;;  %1227 = vmatpush3.bf16.msra.mxu1 %v1319_v42 }
 0x158   :  { %1228 = vmatprep.subr.bf16.mxu1 %v1426_v44 }
 0x15b   :  { %1229 = vmatpush3.bf16.msra.mxu1 %v1320_v43 }
 0x15c   :  { %1230 = vmatprep.subr.bf16.mxu1 %v1426_v44 }
 0x15f   :  { %1231 = vmatpush3.bf16.msra.mxu1 %v1321_v45 }
 0x160   :  { %1232 = vmatprep.subr.bf16.mxu1 %v1426_v44 }
 0x163   :  { %1233 = vmatpush3.bf16.msra.mxu1 %v1322_v46 }
 0x164   :  { %1234 = vmatprep.subr.bf16.mxu1 %v1426_v44 }
 0x167   :  { %1235 = vmatpush3.bf16.msra.mxu1 %v1323_v47 }
 0x168   :  { %1236 = vmatprep.subr.bf16.mxu1 %v1426_v44 }
 0x16b   :  { %1237 = vmatpush3.bf16.msra.mxu1 %v1324_v48 }
 0x16c   :  { %1238 = vmatprep.subr.bf16.mxu1 %v1426_v44 }
 0x16f   :  { %1239 = vmatpush3.bf16.msra.mxu1 %v1325_v57 }
 0x170   :  { %1240 = vmatprep.subr.bf16.mxu1 %v1426_v44  ;;  %v1076_v44 = vld [vmem:[%s1634_s8] ss:$0 sm:$0xff] }
 0x173   :  { %1241 = vmatpush3.bf16.msra.mxu1 %v1326_v58 }
 0x229   :  { %v757_v50 = vpop.f32.mrb[8].mxu1 }
 0x22a   :  { %v758_v51 = vadd.f32 %v1058_v49, %v757_v50  ;;  %v1204_v52 = vpop.f32.mrb[9].mxu1 }
 0x22b   :  { %v760_v53 = vpop.f32.mrb[10].mxu1 }
 0x22c   :  { %v763_v54 = vmax.f32 %v758_v51, 0.0  ;;  %v1205_v55 = vpop.f32.mrb[11].mxu1 }
 0x22e   :  { %v764_v56 = vpack.c.bf16 %v763_v54, %v763_v54 }
 0x230   :  { %1223 = vmatmul.mubr.bf16.vlgmr.msra.gmra.mrb[8].mxu0 %v764_v56 }
 0x303   :  { %v870_v60 = vpop.f32.mrb[8].mxu0 }
 0x304   :  { %v871_v61 = vadd.f32 %v1067_v59, %v870_v60  ;;  %v1224_v62 = vpop.f32.mrb[9].mxu0 }
 0x305   :  { %v873_v63 = vpop.f32.mrb[10].mxu0 }
 0x306   :  { %v876_v0 = vmax.f32 %v871_v61, 0.0  ;;  %v1225_v1 = vpop.f32.mrb[11].mxu0 }
 0x308   :  { %v877_v2 = vpack.c.bf16 %v876_v0, %v876_v0 }
 0x30a   :  { %1243 = vmatmul.mubr.bf16.vlgmr.msra.gmra.mrb[12].mxu1 %v877_v2 }
 0x3dd   :  { %v983_v3 = vpop.f32.mrb[12].mxu1 }
 0x3de   :  { %v984_v4 = vadd.f32 %v1076_v44, %v983_v3  ;;  %v1244_v5 = vpop.f32.mrb[13].mxu1 }
 0x3df   :  { %v986_v6 = vpop.f32.mrb[14].mxu1 }
 0x3e0   :  { %v1245_v7 = vpop.f32.mrb[15].mxu1  ;;  %990 = vst.msk [vmem:[#allocation8] sm:$0xff] %vm989_vm2, %v984_v4 }
 0x3e1   :  { %1404 = shalt.err (!%p1401_p0)
}
 0x3e2   :  { %s1405_s8 = scalar_lea.hbm %s1635_s9, 128 }
 0x3e3   :  { %p1406_p1 = scmp.ne.s32.totalorder %s1635_s9, %s1405_s8  ;;  %p1409_p2 = scmp.lt.u32.totalorder %s1405_s8, %s1635_s9 }
 0x3e5   :  { %p1411_p3 = pnand %p1409_p2, %p1406_p1 }
 0x3e7   :  { %1414 = shalt.err (!%p1411_p3)
}
 0x3e8   :  { %1000 = dma.vmem_to_hbm [thread:$0]  %s998_s15, 128, %s1635_s9, [#allocation4]  }
 0x3e9   :  { %1419 = dma.done.wait [#allocation4], 128  }
 0x3ea   :  { %1420 = vsyncadd [#allocation4], 4294967168 }
 0x3eb   :  { %1004 = vsyncpa [#allocation3], 1 }
 0x3ec   :  { %1005 = vsyncpa [#allocation6], 1 }
 0x3ed   :  { %1006 = vsyncpa [#allocation4], 1 }

</bundles_post_ra>
